<compile_context>
chip_gen: v6e
topology: v6e:2x2x1
jax: 0.10.0
libtpu: 0.0.40
codegen_flags: <defaults>
</compile_context>

<pallas_src>
import math

import jax
import jax.numpy as jnp
from jax import lax
from jax.experimental import pallas as pl
from jax.experimental.pallas import tpu as pltpu


# ---------------------------------------------------------------------------
# In-kernel math helpers (traced inside the Pallas kernel; also used by ref)
# ---------------------------------------------------------------------------
def _layer_norm(x, w, b, eps=1e-5):
    mu = jnp.mean(x, axis=-1, keepdims=True)
    var = jnp.mean((x - mu) ** 2, axis=-1, keepdims=True)
    return (x - mu) * lax.rsqrt(var + eps) * w + b


def _new_gelu(x):
    c = math.sqrt(2.0 / math.pi)
    return 0.5 * x * (1.0 + jnp.tanh(c * (x + 0.044715 * x * x * x)))


# ---------------------------------------------------------------------------
# Pallas kernel: one transformer block for a tile of Bt batch elements
# ---------------------------------------------------------------------------
def _block_kernel(x_ref, ln1w_ref, ln1b_ref, wq_ref, wk_ref, wv_ref, wp_ref,
                  ln2w_ref, ln2b_ref, w0_ref, w1_ref, o_ref):
    f32, bf16 = jnp.float32, jnp.bfloat16
    Bt, T, C = x_ref.shape
    nh, _, hs = wq_ref.shape
    M = Bt * T                                     # batch folded into matmul M

    x = x_ref[...].astype(f32).reshape(M, C)       # (M, C), f32

    # --- attention branch -------------------------------------------------
    h = _layer_norm(x, ln1w_ref[...], ln1b_ref[...])          # f32
    hb = jnp.broadcast_to(h.astype(bf16)[None, :, :], (nh, M, C))

    # Head-batched projections: (nh, M, C) @ (nh, C, hs) -> (nh, M, hs)
    dn_proj = (((2,), (1,)), ((0,), (0,)))
    q = lax.dot_general(hb, wq_ref[...], dn_proj, preferred_element_type=f32)
    k = lax.dot_general(hb, wk_ref[...], dn_proj, preferred_element_type=f32)
    v = lax.dot_general(hb, wv_ref[...], dn_proj, preferred_element_type=f32)

    # Each (head, batch-element) pair becomes one leading batch entry.
    NB = nh * Bt
    qb = q.reshape(NB, T, hs).astype(bf16)         # 1/sqrt(hs) folded into Wq
    kb = k.reshape(NB, T, hs).astype(bf16)
    vb = v.reshape(NB, T, hs).astype(bf16)

    row = lax.broadcasted_iota(jnp.int32, (T, T), 0)
    col = lax.broadcasted_iota(jnp.int32, (T, T), 1)
    causal = col <= row

    dn_qk = (((2,), (2,)), ((0,), (0,)))           # q . k^T (no materialized kT)
    s = lax.dot_general(qb, kb, dn_qk, preferred_element_type=f32)  # (NB, T, T)
    s = jnp.where(causal[None, :, :], s, -1e30)    # finite mask value (robust)
    s = s - jnp.max(s, axis=-1, keepdims=True)
    e = jnp.exp(s)
    p = e * pl.reciprocal(jnp.sum(e, axis=-1, keepdims=True), approx=True)

    dn_pv = (((2,), (1,)), ((0,), (0,)))           # p @ v
    ob = lax.dot_general(p.astype(bf16), vb, dn_pv,
                         preferred_element_type=f32)             # (NB, T, hs)

    # Output projection: per-head (hs, C) blocks, summed over heads
    oh = ob.reshape(nh, M, hs).astype(bf16)
    parts = lax.dot_general(oh, wp_ref[...], dn_pv,
                            preferred_element_type=f32)          # (nh, M, C)
    att = jnp.sum(parts, axis=0)                                 # (M, C)
    x1 = x + att                                                 # residual 1

    # --- feed-forward branch ----------------------------------------------
    h2 = _layer_norm(x1, ln2w_ref[...], ln2b_ref[...])
    f = jnp.dot(h2.astype(bf16), w0_ref[...], preferred_element_type=f32)
    f = _new_gelu(f)                                             # activation_id=3
    f = jnp.dot(f.astype(bf16), w1_ref[...], preferred_element_type=f32)

    # TODO(synk): dropout layers are identity here (eval mode / p = 0).
    o_ref[...] = (x1 + f).reshape(Bt, T, C).astype(o_ref.dtype)  # residual 2


# ---------------------------------------------------------------------------
# Wrapper: pallas_call with batch folded into blocks, <=2 parallel grid steps
# ---------------------------------------------------------------------------
def block_forward(x, params, *, num_heads, head_size):
    B, T, C = x.shape
    assert num_heads * head_size == C
    G = 2 if (B % 2 == 0 and B >= 2) else 1   # 2 steps -> both v7x TCs busy
    Bt = B // G                               # batch tile per grid step

    def full_spec(shape):
        return pl.BlockSpec(shape, lambda g, _n=len(shape): (0,) * _n)

    grid_spec = pltpu.PrefetchScalarGridSpec(
        num_scalar_prefetch=0,
        grid=(G,),
        in_specs=[
            pl.BlockSpec((Bt, T, C), lambda g: (g, 0, 0)),       # x
            full_spec((1, C)), full_spec((1, C)),                # ln1 w, b (f32)
            full_spec((num_heads, C, head_size)),                # Wq (scaled, bf16)
            full_spec((num_heads, C, head_size)),                # Wk (bf16)
            full_spec((num_heads, C, head_size)),                # Wv (bf16)
            full_spec((num_heads, head_size, C)),                # Wproj per-head (bf16)
            full_spec((1, C)), full_spec((1, C)),                # ln2 w, b (f32)
            full_spec((C, 4 * C)), full_spec((4 * C, C)),        # FFN W0^T, W1^T (bf16)
        ],
        out_specs=pl.BlockSpec((Bt, T, C), lambda g: (g, 0, 0)),
    )
    # TODO(synk): at real model sizes (C >= 768) the invariant weight blocks
    # should be single-buffered / K-tiled to respect v7x's 64 MiB VMEM; at
    # C = 32 the default double-buffering costs < 100 KiB so it is left as-is.
    return pl.pallas_call(
        _block_kernel,
        out_shape=jax.ShapeDtypeStruct((B, T, C), x.dtype),
        grid_spec=grid_spec,
        compiler_params=pltpu.CompilerParams(
            dimension_semantics=("parallel",),
            vmem_limit_bytes=32 * 1024 * 1024),
    )(x, params["ln1_w"], params["ln1_b"], params["wq"], params["wk"],
      params["wv"], params["wp"], params["ln2_w"], params["ln2_b"],
      params["w0"], params["w1"])


# ---------------------------------------------------------------------------
# Parameter prep: PyTorch-layout weights -> kernel layout (bf16, pre-scaled)
# ---------------------------------------------------------------------------
def prepare_params(ln1_w, ln1_b, ln2_w, ln2_b,
                   wq_heads, wk_heads, wv_heads, wp, w0, w1, *, head_size):
    # wq_heads/wk_heads/wv_heads: (nh, hs, C)   (per-head nn.Linear weights)
    # wp: (C, C) proj weight (out, in); w0: (4C, C); w1: (C, 4C)
    bf16 = jnp.bfloat16
    nh = wq_heads.shape[0]
    C = wp.shape[0]
    scale = head_size ** -0.5
    to_xw = lambda w: jnp.transpose(w, (0, 2, 1))        # (nh, hs, C) -> (nh, C, hs)
    return {
        "ln1_w": ln1_w.reshape(1, C).astype(jnp.float32),
        "ln1_b": ln1_b.reshape(1, C).astype(jnp.float32),
        "ln2_w": ln2_w.reshape(1, C).astype(jnp.float32),
        "ln2_b": ln2_b.reshape(1, C).astype(jnp.float32),
        "wq": (to_xw(wq_heads) * scale).astype(bf16),    # scale folded into Wq
        "wk": to_xw(wk_heads).astype(bf16),
        "wv": to_xw(wv_heads).astype(bf16),
        "wp": wp.T.reshape(nh, head_size, C).astype(bf16),
        "w0": w0.T.astype(bf16),
        "w1": w1.T.astype(bf16),
    }


# ---------------------------------------------------------------------------
# Pure-JAX reference mirroring the kernel's bf16/f32 precision choices
# ---------------------------------------------------------------------------
def block_reference(x, params, *, num_heads, head_size):
    f32, bf16 = jnp.float32, jnp.bfloat16
    B, T, C = x.shape
    nh, hs = num_heads, head_size
    x2 = x.astype(f32).reshape(B * T, C)

    h = _layer_norm(x2, params["ln1_w"], params["ln1_b"]).astype(bf16)
    q = jnp.einsum("mc,ncd->nmd", h, params["wq"], preferred_element_type=f32)
    k = jnp.einsum("mc,ncd->nmd", h, params["wk"], preferred_element_type=f32)
    v = jnp.einsum("mc,ncd->nmd", h, params["wv"], preferred_element_type=f32)
    q = q.reshape(nh, B, T, hs).astype(bf16)
    k = k.reshape(nh, B, T, hs).astype(bf16)
    v = v.reshape(nh, B, T, hs).astype(bf16)

    s = jnp.einsum("nbqd,nbkd->nbqk", q, k, preferred_element_type=f32)
    causal = jnp.tril(jnp.ones((T, T), bool))
    s = jnp.where(causal, s, -1e30)
    p = jnp.exp(s - jnp.max(s, axis=-1, keepdims=True))
    p = p / jnp.sum(p, axis=-1, keepdims=True)
    o = jnp.einsum("nbqk,nbkd->nbqd", p.astype(bf16), v, preferred_element_type=f32)
    att = jnp.einsum("nmd,ndc->mc", o.reshape(nh, B * T, hs).astype(bf16),
                     params["wp"], preferred_element_type=f32)
    x1 = x2 + att

    h2 = _layer_norm(x1, params["ln2_w"], params["ln2_b"]).astype(bf16)
    f = _new_gelu(jnp.dot(h2, params["w0"], preferred_element_type=f32))
    y = x1 + jnp.dot(f.astype(bf16), params["w1"], preferred_element_type=f32)
    return y.reshape(B, T, C).astype(x.dtype)


# ---------------------------------------------------------------------------
if __name__ == "__main__":
    # Small shapes consistent with the module: block_size (T) = 8, n_embd = 32,
    # num_heads = 4, head_size = 8 (num_heads * head_size == n_embd).
    B, T, C = 2, 8, 32
    num_heads, head_size = 4, 8
    assert num_heads * head_size == C

    key = jax.random.PRNGKey(0)
    ks = jax.random.split(key, 8)
    wscale = 0.02

    # PyTorch-layout weights (per-head Linear weights are (head_size, n_embd)).
    wq_heads = jax.random.normal(ks[0], (num_heads, head_size, C), jnp.float32) * wscale
    wk_heads = jax.random.normal(ks[1], (num_heads, head_size, C), jnp.float32) * wscale
    wv_heads = jax.random.normal(ks[2], (num_heads, head_size, C), jnp.float32) * wscale
    wp = jax.random.normal(ks[3], (C, C), jnp.float32) * wscale        # proj.weight
    w0 = jax.random.normal(ks[4], (4 * C, C), jnp.float32) * wscale    # net[0].weight
    w1 = jax.random.normal(ks[5], (C, 4 * C), jnp.float32) * wscale    # net[1].weight
    ln1_w = jnp.ones((C,), jnp.float32); ln1_b = jnp.zeros((C,), jnp.float32)
    ln2_w = jnp.ones((C,), jnp.float32); ln2_b = jnp.zeros((C,), jnp.float32)

    params = prepare_params(ln1_w, ln1_b, ln2_w, ln2_b,
                            wq_heads, wk_heads, wv_heads, wp, w0, w1,
                            head_size=head_size)

    x = jax.random.normal(ks[6], (B, T, C), jnp.float32)

    out = block_forward(x, params, num_heads=num_heads, head_size=head_size)
    out = jax.block_until_ready(out)

    ref = block_reference(x, params, num_heads=num_heads, head_size=head_size)
    assert out.shape == (B, T, C)
    assert bool(jnp.allclose(out, ref, atol=2e-3, rtol=2e-3)), \
        "mismatch vs JAX reference"

    print("KERNEL_OK")
</pallas_src>

<mosaic_0001>
module attributes {stable_mosaic.version = 11 : i64} {
  func.func @_block_kernel(%arg0: i32, %arg1: memref<1x8x32xf32, #tpu.memory_space<vmem>>, %arg2: memref<1x32xf32, #tpu.memory_space<vmem>>, %arg3: memref<1x32xf32, #tpu.memory_space<vmem>>, %arg4: memref<4x32x8xbf16, #tpu.memory_space<vmem>>, %arg5: memref<4x32x8xbf16, #tpu.memory_space<vmem>>, %arg6: memref<4x32x8xbf16, #tpu.memory_space<vmem>>, %arg7: memref<4x8x32xbf16, #tpu.memory_space<vmem>>, %arg8: memref<1x32xf32, #tpu.memory_space<vmem>>, %arg9: memref<1x32xf32, #tpu.memory_space<vmem>>, %arg10: memref<32x128xbf16, #tpu.memory_space<vmem>>, %arg11: memref<128x32xbf16, #tpu.memory_space<vmem>>, %arg12: memref<1x8x32xf32, #tpu.memory_space<vmem>>) attributes {dimension_semantics = [#tpu.dimension_semantics<parallel>], iteration_bounds = array<i64: 2>, scalar_prefetch = 0 : i64, scratch_operands = 0 : i64, tpu.core_type = #tpu.core_type<tc>, window_params = [{transform_indices = @transform_0, window_bounds = array<i64: 1, 8, 32>}, {pipeline_mode = #tpu.pipeline_mode<synchronous>, transform_indices = @transform_1, window_bounds = array<i64: 1, 32>}, {pipeline_mode = #tpu.pipeline_mode<synchronous>, transform_indices = @transform_2, window_bounds = array<i64: 1, 32>}, {pipeline_mode = #tpu.pipeline_mode<synchronous>, transform_indices = @transform_3, window_bounds = array<i64: 4, 32, 8>}, {pipeline_mode = #tpu.pipeline_mode<synchronous>, transform_indices = @transform_4, window_bounds = array<i64: 4, 32, 8>}, {pipeline_mode = #tpu.pipeline_mode<synchronous>, transform_indices = @transform_5, window_bounds = array<i64: 4, 32, 8>}, {pipeline_mode = #tpu.pipeline_mode<synchronous>, transform_indices = @transform_6, window_bounds = array<i64: 4, 8, 32>}, {pipeline_mode = #tpu.pipeline_mode<synchronous>, transform_indices = @transform_7, window_bounds = array<i64: 1, 32>}, {pipeline_mode = #tpu.pipeline_mode<synchronous>, transform_indices = @transform_8, window_bounds = array<i64: 1, 32>}, {pipeline_mode = #tpu.pipeline_mode<synchronous>, transform_indices = @transform_9, window_bounds = array<i64: 32, 128>}, {pipeline_mode = #tpu.pipeline_mode<synchronous>, transform_indices = @transform_10, window_bounds = array<i64: 128, 32>}, {transform_indices = @transform_11, window_bounds = array<i64: 1, 8, 32>}]} {
    %c0 = arith.constant 0 : index
    %c0_0 = arith.constant 0 : index
    %c0_1 = arith.constant 0 : index
    %0 = vector.load %arg1[%c0, %c0_0, %c0_1] : memref<1x8x32xf32, #tpu.memory_space<vmem>>, vector<1x8x32xf32>
    %1 = vector.shape_cast %0 : vector<1x8x32xf32> to vector<8x32xf32>
    %c0_2 = arith.constant 0 : index
    %c0_3 = arith.constant 0 : index
    %2 = vector.load %arg2[%c0_2, %c0_3] : memref<1x32xf32, #tpu.memory_space<vmem>>, vector<1x32xf32>
    %c0_4 = arith.constant 0 : index
    %c0_5 = arith.constant 0 : index
    %3 = vector.load %arg3[%c0_4, %c0_5] : memref<1x32xf32, #tpu.memory_space<vmem>>, vector<1x32xf32>
    %cst = arith.constant dense<0.000000e+00> : vector<8xf32>
    %4 = vector.multi_reduction <add>, %1, %cst [1] : vector<8x32xf32> to vector<8xf32>
    %5 = vector.shape_cast %4 : vector<8xf32> to vector<8x1xf32>
    %cst_6 = arith.constant 3.200000e+01 : f32
    %6 = vector.broadcast %cst_6 : f32 to vector<8x1xf32>
    %7 = arith.divf %5, %6 : vector<8x1xf32>
    %8 = vector.broadcast %7 : vector<8x1xf32> to vector<8x32xf32>
    %9 = arith.subf %1, %8 : vector<8x32xf32>
    %10 = arith.mulf %9, %9 : vector<8x32xf32>
    %cst_7 = arith.constant dense<0.000000e+00> : vector<8xf32>
    %11 = vector.multi_reduction <add>, %10, %cst_7 [1] : vector<8x32xf32> to vector<8xf32>
    %12 = vector.shape_cast %11 : vector<8xf32> to vector<8x1xf32>
    %cst_8 = arith.constant 3.200000e+01 : f32
    %13 = vector.broadcast %cst_8 : f32 to vector<8x1xf32>
    %14 = arith.divf %12, %13 : vector<8x1xf32>
    %15 = vector.broadcast %7 : vector<8x1xf32> to vector<8x32xf32>
    %16 = arith.subf %1, %15 : vector<8x32xf32>
    %cst_9 = arith.constant 9.99999974E-6 : f32
    %17 = vector.broadcast %cst_9 : f32 to vector<8x1xf32>
    %18 = arith.addf %14, %17 : vector<8x1xf32>
    %19 = math.rsqrt %18 : vector<8x1xf32>
    %20 = vector.broadcast %19 : vector<8x1xf32> to vector<8x32xf32>
    %21 = arith.mulf %16, %20 : vector<8x32xf32>
    %22 = vector.broadcast %2 : vector<1x32xf32> to vector<8x32xf32>
    %23 = arith.mulf %21, %22 : vector<8x32xf32>
    %24 = vector.broadcast %3 : vector<1x32xf32> to vector<8x32xf32>
    %25 = arith.addf %23, %24 : vector<8x32xf32>
    %26 = arith.truncf %25 : vector<8x32xf32> to vector<8x32xbf16>
    %27 = vector.shape_cast %26 : vector<8x32xbf16> to vector<1x8x32xbf16>
    %28 = vector.shape_cast %27 : vector<1x8x32xbf16> to vector<1x8x32xbf16>
    %29 = vector.broadcast %28 : vector<1x8x32xbf16> to vector<4x8x32xbf16>
    %c0_10 = arith.constant 0 : index
    %c0_11 = arith.constant 0 : index
    %c0_12 = arith.constant 0 : index
    %30 = vector.load %arg4[%c0_10, %c0_11, %c0_12] : memref<4x32x8xbf16, #tpu.memory_space<vmem>>, vector<4x32x8xbf16>
    %cst_13 = arith.constant dense<0.000000e+00> : vector<4x8x8xf32>
    %31 = tpu.matmul %29, %30, %cst_13 {dimension_numbers = #tpu.dot_dimension_numbers<[2], [1], [1], [2], [0, 0, 0, 1, 1, 2], [0], [0]>} : vector<4x8x32xbf16>, vector<4x32x8xbf16>, vector<4x8x8xf32> -> vector<4x8x8xf32>
    %c0_14 = arith.constant 0 : index
    %c0_15 = arith.constant 0 : index
    %c0_16 = arith.constant 0 : index
    %32 = vector.load %arg5[%c0_14, %c0_15, %c0_16] : memref<4x32x8xbf16, #tpu.memory_space<vmem>>, vector<4x32x8xbf16>
    %cst_17 = arith.constant dense<0.000000e+00> : vector<4x8x8xf32>
    %33 = tpu.matmul %29, %32, %cst_17 {dimension_numbers = #tpu.dot_dimension_numbers<[2], [1], [1], [2], [0, 0, 0, 1, 1, 2], [0], [0]>} : vector<4x8x32xbf16>, vector<4x32x8xbf16>, vector<4x8x8xf32> -> vector<4x8x8xf32>
    %c0_18 = arith.constant 0 : index
    %c0_19 = arith.constant 0 : index
    %c0_20 = arith.constant 0 : index
    %34 = vector.load %arg6[%c0_18, %c0_19, %c0_20] : memref<4x32x8xbf16, #tpu.memory_space<vmem>>, vector<4x32x8xbf16>
    %cst_21 = arith.constant dense<0.000000e+00> : vector<4x8x8xf32>
    %35 = tpu.matmul %29, %34, %cst_21 {dimension_numbers = #tpu.dot_dimension_numbers<[2], [1], [1], [2], [0, 0, 0, 1, 1, 2], [0], [0]>} : vector<4x8x32xbf16>, vector<4x32x8xbf16>, vector<4x8x8xf32> -> vector<4x8x8xf32>
    %36 = arith.truncf %31 : vector<4x8x8xf32> to vector<4x8x8xbf16>
    %37 = arith.truncf %33 : vector<4x8x8xf32> to vector<4x8x8xbf16>
    %38 = arith.truncf %35 : vector<4x8x8xf32> to vector<4x8x8xbf16>
    %39 = tpu.iota {dimensions = array<i32: 0>} : vector<8x8xi32>
    %40 = tpu.iota {dimensions = array<i32: 1>} : vector<8x8xi32>
    %41 = arith.cmpi sle, %40, %39 : vector<8x8xi32>
    %cst_22 = arith.constant dense<0.000000e+00> : vector<4x8x8xf32>
    %42 = tpu.matmul %36, %37, %cst_22 {dimension_numbers = #tpu.dot_dimension_numbers<[2], [2], [1], [1], [0, 0, 0, 1, 1, 1], [0], [0]>} : vector<4x8x8xbf16>, vector<4x8x8xbf16>, vector<4x8x8xf32> -> vector<4x8x8xf32>
    %43 = vector.shape_cast %41 : vector<8x8xi1> to vector<1x8x8xi1>
    %cst_23 = arith.constant -1.000000e+30 : f32
    %44 = vector.shape_cast %43 : vector<1x8x8xi1> to vector<1x8x8xi1>
    %45 = vector.broadcast %44 : vector<1x8x8xi1> to vector<4x8x8xi1>
    %46 = vector.broadcast %cst_23 : f32 to vector<4x8x8xf32>
    %47 = arith.select %45, %42, %46 : vector<4x8x8xi1>, vector<4x8x8xf32>
    %cst_24 = arith.constant dense<0xFF800000> : vector<4x8xf32>
    %48 = vector.multi_reduction <maximumf>, %47, %cst_24 [2] : vector<4x8x8xf32> to vector<4x8xf32>
    %49 = vector.shape_cast %48 : vector<4x8xf32> to vector<4x8x1xf32>
    %50 = vector.broadcast %49 : vector<4x8x1xf32> to vector<4x8x8xf32>
    %51 = arith.subf %47, %50 : vector<4x8x8xf32>
    %52 = math.exp %51 : vector<4x8x8xf32>
    %cst_25 = arith.constant dense<0.000000e+00> : vector<4x8xf32>
    %53 = vector.multi_reduction <add>, %52, %cst_25 [2] : vector<4x8x8xf32> to vector<4x8xf32>
    %54 = vector.shape_cast %53 : vector<4x8xf32> to vector<4x8x1xf32>
    %55 = tpu.reciprocal %54 {approx = true} : vector<4x8x1xf32> -> vector<4x8x1xf32>
    %56 = vector.broadcast %55 : vector<4x8x1xf32> to vector<4x8x8xf32>
    %57 = arith.mulf %52, %56 : vector<4x8x8xf32>
    %58 = arith.truncf %57 : vector<4x8x8xf32> to vector<4x8x8xbf16>
    %cst_26 = arith.constant dense<0.000000e+00> : vector<4x8x8xf32>
    %59 = tpu.matmul %58, %38, %cst_26 {dimension_numbers = #tpu.dot_dimension_numbers<[2], [1], [1], [2], [0, 0, 0, 1, 1, 2], [0], [0]>} : vector<4x8x8xbf16>, vector<4x8x8xbf16>, vector<4x8x8xf32> -> vector<4x8x8xf32>
    %60 = arith.truncf %59 : vector<4x8x8xf32> to vector<4x8x8xbf16>
    %c0_27 = arith.constant 0 : index
    %c0_28 = arith.constant 0 : index
    %c0_29 = arith.constant 0 : index
    %61 = vector.load %arg7[%c0_27, %c0_28, %c0_29] : memref<4x8x32xbf16, #tpu.memory_space<vmem>>, vector<4x8x32xbf16>
    %cst_30 = arith.constant dense<0.000000e+00> : vector<4x8x32xf32>
    %62 = tpu.matmul %60, %61, %cst_30 {dimension_numbers = #tpu.dot_dimension_numbers<[2], [1], [1], [2], [0, 0, 0, 1, 1, 2], [0], [0]>} : vector<4x8x8xbf16>, vector<4x8x32xbf16>, vector<4x8x32xf32> -> vector<4x8x32xf32>
    %cst_31 = arith.constant dense<0.000000e+00> : vector<8x32xf32>
    %63 = vector.multi_reduction <add>, %62, %cst_31 [0] : vector<4x8x32xf32> to vector<8x32xf32>
    %64 = arith.addf %1, %63 : vector<8x32xf32>
    %c0_32 = arith.constant 0 : index
    %c0_33 = arith.constant 0 : index
    %65 = vector.load %arg8[%c0_32, %c0_33] : memref<1x32xf32, #tpu.memory_space<vmem>>, vector<1x32xf32>
    %c0_34 = arith.constant 0 : index
    %c0_35 = arith.constant 0 : index
    %66 = vector.load %arg9[%c0_34, %c0_35] : memref<1x32xf32, #tpu.memory_space<vmem>>, vector<1x32xf32>
    %cst_36 = arith.constant dense<0.000000e+00> : vector<8xf32>
    %67 = vector.multi_reduction <add>, %64, %cst_36 [1] : vector<8x32xf32> to vector<8xf32>
    %68 = vector.shape_cast %67 : vector<8xf32> to vector<8x1xf32>
    %cst_37 = arith.constant 3.200000e+01 : f32
    %69 = vector.broadcast %cst_37 : f32 to vector<8x1xf32>
    %70 = arith.divf %68, %69 : vector<8x1xf32>
    %71 = vector.broadcast %70 : vector<8x1xf32> to vector<8x32xf32>
    %72 = arith.subf %64, %71 : vector<8x32xf32>
    %73 = arith.mulf %72, %72 : vector<8x32xf32>
    %cst_38 = arith.constant dense<0.000000e+00> : vector<8xf32>
    %74 = vector.multi_reduction <add>, %73, %cst_38 [1] : vector<8x32xf32> to vector<8xf32>
    %75 = vector.shape_cast %74 : vector<8xf32> to vector<8x1xf32>
    %cst_39 = arith.constant 3.200000e+01 : f32
    %76 = vector.broadcast %cst_39 : f32 to vector<8x1xf32>
    %77 = arith.divf %75, %76 : vector<8x1xf32>
    %78 = vector.broadcast %70 : vector<8x1xf32> to vector<8x32xf32>
    %79 = arith.subf %64, %78 : vector<8x32xf32>
    %cst_40 = arith.constant 9.99999974E-6 : f32
    %80 = vector.broadcast %cst_40 : f32 to vector<8x1xf32>
    %81 = arith.addf %77, %80 : vector<8x1xf32>
    %82 = math.rsqrt %81 : vector<8x1xf32>
    %83 = vector.broadcast %82 : vector<8x1xf32> to vector<8x32xf32>
    %84 = arith.mulf %79, %83 : vector<8x32xf32>
    %85 = vector.broadcast %65 : vector<1x32xf32> to vector<8x32xf32>
    %86 = arith.mulf %84, %85 : vector<8x32xf32>
    %87 = vector.broadcast %66 : vector<1x32xf32> to vector<8x32xf32>
    %88 = arith.addf %86, %87 : vector<8x32xf32>
    %89 = arith.truncf %88 : vector<8x32xf32> to vector<8x32xbf16>
    %c0_41 = arith.constant 0 : index
    %c0_42 = arith.constant 0 : index
    %90 = vector.load %arg10[%c0_41, %c0_42] : memref<32x128xbf16, #tpu.memory_space<vmem>>, vector<32x128xbf16>
    %cst_43 = arith.constant dense<0.000000e+00> : vector<8x128xf32>
    %91 = tpu.matmul %89, %90, %cst_43 {dimension_numbers = #tpu.dot_dimension_numbers<[1], [0], [0], [1], [0, 0, 1, 1], [], []>} : vector<8x32xbf16>, vector<32x128xbf16>, vector<8x128xf32> -> vector<8x128xf32>
    %cst_44 = arith.constant 5.000000e-01 : f32
    %92 = vector.broadcast %cst_44 : f32 to vector<8x128xf32>
    %93 = arith.mulf %92, %91 : vector<8x128xf32>
    %cst_45 = arith.constant 4.471500e-02 : f32
    %94 = vector.broadcast %cst_45 : f32 to vector<8x128xf32>
    %95 = arith.mulf %94, %91 : vector<8x128xf32>
    %96 = arith.mulf %95, %91 : vector<8x128xf32>
    %97 = arith.mulf %96, %91 : vector<8x128xf32>
    %98 = arith.addf %91, %97 : vector<8x128xf32>
    %cst_46 = arith.constant 0.797884583 : f32
    %99 = vector.broadcast %cst_46 : f32 to vector<8x128xf32>
    %100 = arith.mulf %99, %98 : vector<8x128xf32>
    %101 = math.tanh %100 : vector<8x128xf32>
    %cst_47 = arith.constant 1.000000e+00 : f32
    %102 = vector.broadcast %cst_47 : f32 to vector<8x128xf32>
    %103 = arith.addf %102, %101 : vector<8x128xf32>
    %104 = arith.mulf %93, %103 : vector<8x128xf32>
    %105 = arith.truncf %104 : vector<8x128xf32> to vector<8x128xbf16>
    %c0_48 = arith.constant 0 : index
    %c0_49 = arith.constant 0 : index
    %106 = vector.load %arg11[%c0_48, %c0_49] : memref<128x32xbf16, #tpu.memory_space<vmem>>, vector<128x32xbf16>
    %cst_50 = arith.constant dense<0.000000e+00> : vector<8x32xf32>
    %107 = tpu.matmul %105, %106, %cst_50 {dimension_numbers = #tpu.dot_dimension_numbers<[1], [0], [0], [1], [0, 0, 1, 1], [], []>} : vector<8x128xbf16>, vector<128x32xbf16>, vector<8x32xf32> -> vector<8x32xf32>
    %108 = arith.addf %64, %107 : vector<8x32xf32>
    %109 = vector.shape_cast %108 : vector<8x32xf32> to vector<1x8x32xf32>
    %c0_51 = arith.constant 0 : index
    %c0_52 = arith.constant 0 : index
    %c0_53 = arith.constant 0 : index
    %110 = vector.load %arg12[%c0_51, %c0_52, %c0_53] : memref<1x8x32xf32, #tpu.memory_space<vmem>>, vector<1x8x32xf32>
    tpu.vector_store %arg12[%c0_51, %c0_52, %c0_53], %109 {strides = array<i32>} : memref<1x8x32xf32, #tpu.memory_space<vmem>>, vector<1x8x32xf32>,
    return
  }
  func.func @transform_0(%arg0: i32) -> (i32, i32, i32) {
    %c0_i32 = arith.constant 0 : i32
    %c0_i32_0 = arith.constant 0 : i32
    %c0_i32_1 = arith.constant 0 : i32
    return %arg0, %c0_i32, %c0_i32_0 : i32, i32, i32
  }
  func.func @transform_1(%arg0: i32) -> (i32, i32) {
    %c0_i32 = arith.constant 0 : i32
    %c0_i32_0 = arith.constant 0 : i32
    %c0_i32_1 = arith.constant 0 : i32
    return %c0_i32, %c0_i32_0 : i32, i32
  }
  func.func @transform_2(%arg0: i32) -> (i32, i32) {
    %c0_i32 = arith.constant 0 : i32
    %c0_i32_0 = arith.constant 0 : i32
    %c0_i32_1 = arith.constant 0 : i32
    return %c0_i32, %c0_i32_0 : i32, i32
  }
  func.func @transform_3(%arg0: i32) -> (i32, i32, i32) {
    %c0_i32 = arith.constant 0 : i32
    %c0_i32_0 = arith.constant 0 : i32
    %c0_i32_1 = arith.constant 0 : i32
    %c0_i32_2 = arith.constant 0 : i32
    return %c0_i32, %c0_i32_0, %c0_i32_1 : i32, i32, i32
  }
  func.func @transform_4(%arg0: i32) -> (i32, i32, i32) {
    %c0_i32 = arith.constant 0 : i32
    %c0_i32_0 = arith.constant 0 : i32
    %c0_i32_1 = arith.constant 0 : i32
    %c0_i32_2 = arith.constant 0 : i32
    return %c0_i32, %c0_i32_0, %c0_i32_1 : i32, i32, i32
  }
  func.func @transform_5(%arg0: i32) -> (i32, i32, i32) {
    %c0_i32 = arith.constant 0 : i32
    %c0_i32_0 = arith.constant 0 : i32
    %c0_i32_1 = arith.constant 0 : i32
    %c0_i32_2 = arith.constant 0 : i32
    return %c0_i32, %c0_i32_0, %c0_i32_1 : i32, i32, i32
  }
  func.func @transform_6(%arg0: i32) -> (i32, i32, i32) {
    %c0_i32 = arith.constant 0 : i32
    %c0_i32_0 = arith.constant 0 : i32
    %c0_i32_1 = arith.constant 0 : i32
    %c0_i32_2 = arith.constant 0 : i32
    return %c0_i32, %c0_i32_0, %c0_i32_1 : i32, i32, i32
  }
  func.func @transform_7(%arg0: i32) -> (i32, i32) {
    %c0_i32 = arith.constant 0 : i32
    %c0_i32_0 = arith.constant 0 : i32
    %c0_i32_1 = arith.constant 0 : i32
    return %c0_i32, %c0_i32_0 : i32, i32
  }
  func.func @transform_8(%arg0: i32) -> (i32, i32) {
    %c0_i32 = arith.constant 0 : i32
    %c0_i32_0 = arith.constant 0 : i32
    %c0_i32_1 = arith.constant 0 : i32
    return %c0_i32, %c0_i32_0 : i32, i32
  }
  func.func @transform_9(%arg0: i32) -> (i32, i32) {
    %c0_i32 = arith.constant 0 : i32
    %c0_i32_0 = arith.constant 0 : i32
    %c0_i32_1 = arith.constant 0 : i32
    return %c0_i32, %c0_i32_0 : i32, i32
  }
  func.func @transform_10(%arg0: i32) -> (i32, i32) {
    %c0_i32 = arith.constant 0 : i32
    %c0_i32_0 = arith.constant 0 : i32
    %c0_i32_1 = arith.constant 0 : i32
    return %c0_i32, %c0_i32_0 : i32, i32
  }
  func.func @transform_11(%arg0: i32) -> (i32, i32, i32) {
    %c0_i32 = arith.constant 0 : i32
    %c0_i32_0 = arith.constant 0 : i32
    %c0_i32_1 = arith.constant 0 : i32
    return %arg0, %c0_i32, %c0_i32_0 : i32, i32, i32
  }
}

</mosaic_0001>

<bundles_post_ra>
// kernel: tpu_custom_call.1
= control target key start
LH: loop header
LB: loop body
LE: loop exit
PB: predicated region body
PF: predicated region fallthrough
CT: control target
= control target key end

     0   :  { %s2986_s0 = inlined_call_operand.vmem [shape: f32[2,8,32], index: 0, kind: input, shape index: {}]   ;;  %s2987_s1 = inlined_call_operand.vmem [shape: f32[1,32], index: 1, kind: input, shape index: {}]   ;;  %s2988_s2 = inlined_call_operand.vmem [shape: f32[1,32], index: 2, kind: input, shape index: {}]   ;;  %s2989_s3 = inlined_call_operand.vmem [shape: bf16[4,32,8], index: 3, kind: input, shape index: {}]   ;;  %s2990_s4 = inlined_call_operand.vmem [shape: bf16[4,32,8], index: 4, kind: input, shape index: {}]   ;;  %s2991_s5 = inlined_call_operand.vmem [shape: bf16[4,32,8], index: 5, kind: input, shape index: {}]   ;;  %s2992_s6 = inlined_call_operand.vmem [shape: bf16[4,8,32], index: 6, kind: input, shape index: {}]   ;;  %s2993_s7 = inlined_call_operand.vmem [shape: f32[1,32], index: 7, kind: input, shape index: {}]   ;;  %s2994_s8 = inlined_call_operand.vmem [shape: f32[1,32], index: 8, kind: input, shape index: {}]   ;;  %s2995_s9 = inlined_call_operand.vmem [shape: bf16[32,128], index: 9, kind: input, shape index: {}]   ;;  %s2996_s10 = inlined_call_operand.vmem [shape: bf16[128,32], index: 10, kind: input, shape index: {}]   ;;  %s2997_s11 = inlined_call_operand.hbm [shape: f32[2,8,32], index: 11, kind: output, shape index: {}]  }
   0x1   :  { %2998 = sst [smem:[#allocation5_spill]] %s2986_s0 }
   0x2   :  { %16 = vsyncpa [#allocation3], 0 }
   0x3   :  { %18 = vsyncpa [#allocation3 + $0x1], 0  ;;  %s2573_s17 = smov 0   ;;  %s2575_s18 = smov 0  }
   0x4   :  { %s2577_s19 = smov 0   ;;  %s2579_s20 = smov 0  }
   0x5 LB: > { %s2594_s21 = sadd.s32 4294967295, %s2508_s20   ;;  %s2010_s22 = sadd.s32 4294967294, %s2508_s20   ;;  %s2508_s20 = sphi %s2579_s20, %s3005_s20   ;;  %s2504_s19 = sphi %s2577_s19, %s3004_s19   ;;  %s2500_s18 = sphi %s2575_s18, %s3003_s18   ;;  %s2496_s17 = sphi %s2573_s17, %s3002_s17  }
   0x6   : > { %s2598_s23 = sadd.s32 1, %s2508_s20   ;;  %s267_s24 = sadd.s32 1, %s2504_s19 }
   0x7   : > { %s264_s25 = ssub.s32 %s2508_s20, %s2598_s23  ;;  %p277_p0 = scmp.ne.s32.totalorder %s2504_s19, %s2500_s18 }
   0x8   : > { %p265_p1 = scmp.eq.s32.totalorder %s264_s25, 0  ;;  %p278_p2 = scmp.eq.s32.totalorder %s2594_s21, 1 }
   0x9   : > { %p283_p3 = scmp.ne.s32.totalorder %s2500_s18, %s2496_s17  ;;  %p284_p4 = scmp.eq.s32.totalorder %s2010_s22, 1 }
   0xa   : > { %s2609_s26 = scalar_select %p265_p1, %s2504_s19, %s267_s24  }
   0xb   : > { %p2611_p5 = por %p278_p2, %p277_p0  ;;  %p2615_p6 = por %p284_p4, %p283_p3 }
   0xc   : > { %p2013_p7 = scmp.ge.s32.totalorder %s2508_s20, 1  ;;  %p339_p8 = scmp.lt.s32.totalorder %s2508_s20, 3 }
   0xe   : > { %p340_p9 = pnand %p2013_p7, %p339_p8 }
   0xf   : > { %p378_p10 = scmp.lt.s32.totalorder (!%p340_p9), %s2594_s21, 1  ;;  %s3001_s0 = sld [smem:[#allocation5_spill]] (!%p340_p9) }
  0x10   : > { %343 = sbr.rel (%p340_p9) target bundleno = 2218 (0x8aa), region = 64  ;;  %s375_s25 = sand.u32 (!%p340_p9), 1, %s2500_s18  }
  0x11   : > { %s2512_s24 = smov (!%p340_p9), [#allocation2]  }
  0x15   : > { %s379_s29 = scalar_select %p378_p10, %s2594_s21, 1  ;;  %vm386_vm0 = vcmask 261120   ;;  %v2392_v7 = vld [vmem:[%s2989_s3 + $0x8] sm:$0xff]   ;;  %v2393_v8 = vld [vmem:[%s2989_s3 + $0x38] sm:$0xff]   ;;  %v2510_v9 = vmov 0.0   ;;  %v2394_v10 = vld [vmem:[%s2989_s3] sm:$0xff]  }
  0x16   : > { %2155 = vmatprep.subr.bf16.mxu0 %v2510_v9  ;;  %2179 = vmatprep.subr.bf16.mxu1 %v2510_v9  ;;  %v2395_v11 = vld [vmem:[%s2989_s3 + $0x30] sm:$0xff]   ;;  %vm2511_vm1 = vmmov 0   ;;  %v2016_v16 = vld [vmem:[%s2987_s1] ss:$0 sm:$0xff]  ;;  %v2396_v21 = vld [vmem:[%s2989_s3 + $0x18] sm:$0xff]   ;;  %vm1108_vm2 = vcmask 64512  }
  0x17   : > { %s2015_s30 = sshll.u32 %s379_s29, 3  ;;  %2156 = vmatpush3.bf16.msra.mxu0 %v2392_v7  ;;  %2180 = vmatpush3.bf16.msra.mxu1 %v2393_v8  ;;  %v2017_v18 = vld [vmem:[%s2988_s2] ss:$0 sm:$0xff]  ;;  %v2397_v22 = vld [vmem:[%s2990_s4 + $0x18] sm:$0xff]   ;;  %v2398_v24 = vld [vmem:[%s2989_s3 + $0x10] sm:$0xff]   ;;  %vm1350_vm3 = vcmask 1043456  }
  0x18   : > { %s381_s14 = scalar_lea.vmem %s3001_s0, %s2015_s30  ;;  %2157 = vmatprep.subr.bf16.mxu0 %v2510_v9  ;;  %2181 = vmatprep.subr.bf16.mxu1 %v2510_v9  ;;  %v2399_v25 = vld [vmem:[%s2990_s4 + $0x10] sm:$0xff]   ;;  %v2400_v26 = vld [vmem:[%s2989_s3 + $0x28] sm:$0xff]   ;;  %v2401_v27 = vld [vmem:[%s2990_s4 + $0x38] sm:$0xff]   ;;  %s2014_s29 = sshll.u32 %s375_s25, 3 }
  0x19   : > { %v2626_v0 = vld [vmem:[%s381_s14] sm:$0xff]  ;;  %2159 = vmatprep.mubr.msk.bf16.mxu0 %vm2511_vm1, %v2510_v9  ;;  %2183 = vmatprep.mubr.msk.bf16.mxu1 %vm2511_vm1, %v2510_v9  ;;  %v2403_v29 = vld [vmem:[%s2990_s4 + $0x30] sm:$0xff]   ;;  %v2404_v30 = vld [vmem:[%s2990_s4 + $0x8] sm:$0xff]   ;;  %s2080_s30 = sshll.u32 %s2594_s21, 7  ;;  %s377_s12 = scalar_lea.vmem [#allocation2], %s2014_s29 }
  0x1a   : > { %v387_v1 = vsel %vm386_vm0, %v2626_v0, 0.0  ;;  %v2402_v28 = vld [vmem:[%s2989_s3 + $0x20] sm:$0xff]   ;;  %v2405_v31 = vld [vmem:[%s2991_s5 + $0x18] sm:$0xff]   ;;  %v2407_v33 = vld [vmem:[%s2991_s5 + $0x10] sm:$0xff]   ;;  %s1951_s13 = sshll.u32 %s377_s12, 4  ;;  %s2944_s16 = scalar_lea.hbm %s2997_s11, %s2080_s30  ;;  %s2946_s13 = int_to_ptr.vmem [resolvable:$true] %s1951_s13 }
  0x1b   : > { %388 = vadd.xlane.f32.xlu0 %v387_v1  ;;  %2158 = vmatpush3.bf16.msra.mxu0 %v2394_v10  ;;  %v2406_v32 = vld [vmem:[%s2990_s4] sm:$0xff]   ;;  %v2408_v34 = vld [vmem:[%s2990_s4 + $0x28] sm:$0xff]   ;;  %v2409_v35 = vld [vmem:[%s2991_s5 + $0x38] sm:$0xff]   ;;  %s1938_s21 = scalar_lea.sflag [#allocation3], %s375_s25  ;;  %s2448_s22 = scalar_lea.vmem %s2946_s13, 128 }
  0x1c   : > { %2182 = vmatpush3.bf16.msra.mxu1 %v2395_v11  ;;  %2163 = vmatprep.subr.bf16.mxu0 %v2510_v9  ;;  %v2410_v36 = vld [vmem:[%s2990_s4 + $0x20] sm:$0xff]   ;;  %v2411_v37 = vld [vmem:[%s2991_s5 + $0x30] sm:$0xff]   ;;  %v2412_v38 = vld [vmem:[%s2991_s5 + $0x8] sm:$0xff]   ;;  %p2449_p11 = scmp.ne.s32.totalorder %s2946_s13, %s2448_s22  ;;  %s2452_s29 = sshll.u32 %s2512_s24, 4  ;;  %s2453_s29 = int_to_ptr.vmem [resolvable:$false] %s2452_s29 }
  0x1d   : > { %2195 = vmatprep.subr.bf16.mxu1 %v2510_v9  ;;  %v2413_v39 = vld [vmem:[%s2991_s5] sm:$0xff]   ;;  %v2414_v40 = vld [vmem:[%s2991_s5 + $0x28] sm:$0xff]   ;;  %s2454_s30 = scalar_lea.vmem %s2453_s29, 256  ;;  %p2455_p0 = scmp.lt.s32.totalorder %s2946_s13, %s2453_s29 }
  0x1e   : > { %v2415_v41 = vld [vmem:[%s2991_s5 + $0x20] sm:$0xff]   ;;  %p2450_p12 = pnand %p2449_p11, %p2611_p5  ;;  %p2456_p1 = scmp.lt.s32.totalorder %s2454_s30, %s2448_s22 }
  0x20   : > { %p2451_p13 = pneg %p2450_p12  ;;  %p2457_p2 = por %p2456_p1, %p2455_p0 }
  0x22   : > { %p2458_p3 = pnand %p2457_p2, %p2451_p13 }
  0xa4   : > { %v389_v2 = vpop.xlane.xlu0 %388 }
  0xa5   : > { %v391_v3 = vmul.f32 0.03125, %v389_v2 }
  0xa7   : > { %v392_v4 = vsub.f32 %v2626_v0, %v391_v3 }
  0xa9   : > { %v393_v5 = vmul.f32 %v392_v4, %v392_v4 }
  0xab   : > { %v394_v6 = vsel %vm386_vm0, %v393_v5, 0.0 }
  0xac   : > { %395 = vadd.xlane.f32.xlu0 %v394_v6 }
 0x135   : > { %v396_v12 = vpop.xlane.xlu0 %395 }
 0x136   : > { %v397_v13 = vmul.f32 0.03125, %v396_v12 }
 0x138   : > { %v398_v14 = vadd.f32 1e-05, %v397_v13 }
 0x13a   : > { %2426 = vrsqrt.f32 %v398_v14 }
 0x147   : > { %v2427_v15 = vpop.eup %2426 }
 0x148   : > { %v400_v17 = vmul.f32 %v2427_v15, %v392_v4 }
 0x14a   : > { %v407_v19 = vmul.f32 %v2016_v16, %v400_v17 }
 0x14c   : > { %v414_v20 = vadd.f32 %v2017_v18, %v407_v19 }
 0x14e   : > { %v2666_v23 = vpack.c.bf16 %v414_v20, %v414_v20 }
 0x150   : > { %2160 = vmatmul.mubr.msk.bf16.vlgmr.msra.gmra.mxu0 %vm386_vm0, %v2666_v23  ;;  %2184 = vmatmul.mubr.msk.bf16.vlgmr.msra.gmra.mxu1 %vm386_vm0, %v2666_v23 }
 0x151   : > { %2164 = vmatpush3.bf16.msra.mxu0 %v2396_v21  ;;  %2196 = vmatpush3.bf16.msra.mxu1 %v2397_v22 }
 0x152   : > { %2165 = vmatprep.subr.bf16.mxu0 %v2510_v9  ;;  %2197 = vmatprep.subr.bf16.mxu1 %v2510_v9 }
 0x153   : > { %2167 = vmatprep.mubr.msk.bf16.mxu0 %vm2511_vm1, %v2510_v9  ;;  %2199 = vmatprep.mubr.msk.bf16.mxu1 %vm2511_vm1, %v2510_v9 }
 0x155   : > { %2166 = vmatpush3.bf16.msra.mxu0 %v2398_v24  ;;  %2198 = vmatpush3.bf16.msra.mxu1 %v2399_v25 }
 0x156   : > { %2171 = vmatprep.subr.bf16.mxu0 %v2510_v9  ;;  %2211 = vmatprep.subr.bf16.mxu1 %v2510_v9 }
 0x158   : > { %2168 = vmatmul.mubr.msk.bf16.vlgmr.msra.gmra.mxu0 %vm386_vm0, %v2666_v23  ;;  %2200 = vmatmul.mubr.msk.bf16.vlgmr.msra.gmra.mxu1 %vm386_vm0, %v2666_v23 }
 0x159   : > { %2172 = vmatpush3.bf16.msra.mxu0 %v2400_v26  ;;  %2212 = vmatpush3.bf16.msra.mxu1 %v2401_v27 }
 0x15a   : > { %2173 = vmatprep.subr.bf16.mxu0 %v2510_v9  ;;  %2213 = vmatprep.subr.bf16.mxu1 %v2510_v9 }
 0x15b   : > { %2175 = vmatprep.mubr.msk.bf16.mxu0 %vm2511_vm1, %v2510_v9  ;;  %2215 = vmatprep.mubr.msk.bf16.mxu1 %vm2511_vm1, %v2510_v9 }
 0x15d   : > { %2174 = vmatpush3.bf16.msra.mxu0 %v2402_v28  ;;  %2214 = vmatpush3.bf16.msra.mxu1 %v2403_v29 }
 0x15e   : > { %2187 = vmatprep.subr.bf16.mxu0 %v2510_v9  ;;  %2227 = vmatprep.subr.bf16.mxu1 %v2510_v9 }
 0x160   : > { %2176 = vmatmul.mubr.msk.bf16.vlgmr.msra.gmra.mxu0 %vm386_vm0, %v2666_v23  ;;  %2216 = vmatmul.mubr.msk.bf16.vlgmr.msra.gmra.mxu1 %vm386_vm0, %v2666_v23 }
 0x161   : > { %2188 = vmatpush3.bf16.msra.mxu0 %v2404_v30  ;;  %2228 = vmatpush3.bf16.msra.mxu1 %v2405_v31 }
 0x162   : > { %2189 = vmatprep.subr.bf16.mxu0 %v2510_v9  ;;  %2229 = vmatprep.subr.bf16.mxu1 %v2510_v9 }
 0x163   : > { %2191 = vmatprep.mubr.msk.bf16.mxu0 %vm2511_vm1, %v2510_v9  ;;  %2231 = vmatprep.mubr.msk.bf16.mxu1 %vm2511_vm1, %v2510_v9 }
 0x165   : > { %2190 = vmatpush3.bf16.msra.mxu0 %v2406_v32  ;;  %2230 = vmatpush3.bf16.msra.mxu1 %v2407_v33 }
 0x166   : > { %2203 = vmatprep.subr.bf16.mxu0 %v2510_v9  ;;  %2243 = vmatprep.subr.bf16.mxu1 %v2510_v9 }
 0x168   : > { %2192 = vmatmul.mubr.msk.bf16.vlgmr.msra.gmra.mxu0 %vm386_vm0, %v2666_v23  ;;  %2232 = vmatmul.mubr.msk.bf16.vlgmr.msra.gmra.mxu1 %vm386_vm0, %v2666_v23 }
 0x169   : > { %2204 = vmatpush3.bf16.msra.mxu0 %v2408_v34  ;;  %2244 = vmatpush3.bf16.msra.mxu1 %v2409_v35 }
 0x16a   : > { %2205 = vmatprep.subr.bf16.mxu0 %v2510_v9  ;;  %2245 = vmatprep.subr.bf16.mxu1 %v2510_v9 }
 0x16b   : > { %2207 = vmatprep.mubr.msk.bf16.mxu0 %vm2511_vm1, %v2510_v9  ;;  %2247 = vmatprep.mubr.msk.bf16.mxu1 %vm2511_vm1, %v2510_v9 }
 0x16d   : > { %2206 = vmatpush3.bf16.msra.mxu0 %v2410_v36  ;;  %2246 = vmatpush3.bf16.msra.mxu1 %v2411_v37 }
 0x16e   : > { %2219 = vmatprep.subr.bf16.mxu0 %v2510_v9  ;;  %2257 = vmatprep.subr.bf16.mxu1 %v2510_v9 }
 0x170   : > { %2208 = vmatmul.mubr.msk.bf16.vlgmr.msra.gmra.mxu0 %vm386_vm0, %v2666_v23  ;;  %2248 = vmatmul.mubr.msk.bf16.vlgmr.msra.gmra.mxu1 %vm386_vm0, %v2666_v23 }
 0x171   : > { %2220 = vmatpush3.bf16.msra.mxu0 %v2412_v38  ;;  %2223 = vmatprep.mubr.msk.bf16.mxu0 %vm2511_vm1, %v2510_v9 }
 0x172   : > { %2221 = vmatprep.subr.bf16.mxu0 %v2510_v9  ;;  %2259 = vmatprep.mubr.msk.bf16.mxu1 %vm2511_vm1, %v2510_v9 }
 0x175   : > { %2222 = vmatpush3.bf16.msra.mxu0 %v2413_v39 }
 0x176   : > { %2235 = vmatprep.subr.bf16.mxu0 %v2510_v9 }
 0x178   : > { %2224 = vmatmul.mubr.msk.bf16.vlgmr.msra.gmra.mxu0 %vm386_vm0, %v2666_v23 }
 0x179   : > { %2236 = vmatpush3.bf16.msra.mxu0 %v2414_v40  ;;  %2239 = vmatprep.mubr.msk.bf16.mxu0 %vm2511_vm1, %v2510_v9 }
 0x17a   : > { %2237 = vmatprep.subr.bf16.mxu0 %v2510_v9 }
 0x17d   : > { %2238 = vmatpush3.bf16.msra.mxu0 %v2415_v41 }
 0x17e   : > { %2251 = vmatprep.subr.bf16.mxu0 %v2510_v9 }
 0x180   : > { %2240 = vmatmul.mubr.msk.bf16.vlgmr.msra.gmra.mxu0 %vm386_vm0, %v2666_v23 }
 0x181   : > { %2253 = vmatprep.mubr.msk.bf16.mxu0 %vm2511_vm1, %v2510_v9 }
 0x210   : > { %v2790_v42 = vpop.f32.mrf.mxu0  ;;  %v637_v43 = vpop.f32.mrf.mxu1 }
 0x211   : > { %v1094_v11 = vpack.c.bf16 %v637_v43, %v637_v43  ;;  %v1091_v24 = vpack.c.bf16 %v2790_v42, %v2790_v42 }
 0x212   : > { %v2161_v44 = vpop.f32.mrf.mxu0  ;;  %v2185_v45 = vpop.f32.mrf.mxu1 }
 0x214   : > { %v484_v46 = vpop.f32.mrf.mxu0  ;;  %v640_v47 = vpop.f32.mrf.mxu1 }
 0x216   : > { %v2162_v48 = vpop.f32.mrf.mxu0  ;;  %v2186_v49 = vpop.f32.mrf.mxu1 }
 0x217   : > { %v1103_v48 = vlaneseq }
 0x218   : > { %v533_v50 = vpop.f32.mrf.mxu0  ;;  %v757_v51 = vpop.f32.mrf.mxu1 }
 0x219   : > { %v1096_v52 = vpack.c.bf16 %v757_v51, %v757_v51  ;;  %v1092_v62 = vpack.c.bf16 %v533_v50, %v533_v50  ;;  %v1104_v51 = vshrl.u32 %v1103_v48, 7 }
 0x21a   : > { %v2169_v53 = vpop.f32.mrf.mxu0  ;;  %v2201_v54 = vpop.f32.mrf.mxu1 }
 0x21b   : > { %v1159_v55 = vsel %vm1108_vm2, %v1096_v52, 0  ;;  %v1106_v52 = vand.u32 127, %v1103_v48 }
 0x21c   : > { %v536_v56 = vpop.f32.mrf.mxu0  ;;  %v760_v57 = vpop.f32.mrf.mxu1  ;;  %2258 = vmatpush3.bf16.xpose.msra.mxu1 %v1159_v55 }
 0x21d   : > { %2269 = vmatprep.subr.bf16.mxu1 %v2510_v9  ;;  %vm1107_vm4 = vcmp.le.s32.totalorder %v1106_v52, %v1104_v51  ;;  %v1537_v51 = vld [vmem:[%s2992_s6 + $0x4] sm:$0xf] }
 0x21e   : > { %v2170_v58 = vpop.f32.mrf.mxu0  ;;  %v2202_v59 = vpop.f32.mrf.mxu1  ;;  %v1590_v52 = vsel %vm1350_vm3, %v1537_v51, 0 }
 0x220   : > { %v585_v60 = vpop.f32.mrf.mxu0  ;;  %v861_v61 = vpop.f32.mrf.mxu1 }
 0x221   : > { %v1098_v63 = vpack.c.bf16 %v861_v61, %v861_v61  ;;  %v1093_v34 = vpack.c.bf16 %v585_v60, %v585_v60 }
 0x222   : > { %v2177_v1 = vpop.f32.mrf.mxu0  ;;  %v2217_v2 = vpop.f32.mrf.mxu1 }
 0x223   : > { %v1251_v3 = vsel %vm1108_vm2, %v1098_v63, 0  ;;  %2260 = vmatmul.mubr.msk.bf16.vlgmr.msra.gmra.mxu1 %vm1108_vm2, %v1092_v62 }
 0x224   : > { %v588_v4 = vpop.f32.mrf.mxu0  ;;  %v864_v5 = vpop.f32.mrf.mxu1  ;;  %2270 = vmatpush3.bf16.xpose.msra.mxu1 %v1251_v3  ;;  %2271 = vmatprep.mubr.msk.bf16.mxu1 %vm2511_vm1, %v2510_v9 }
 0x225   : > { %2281 = vmatprep.subr.bf16.mxu1 %v2510_v9 }
 0x226   : > { %v2178_v6 = vpop.f32.mrf.mxu0  ;;  %v2218_v7 = vpop.f32.mrf.mxu1 }
 0x228   : > { %v705_v8 = vpop.f32.mrf.mxu0  ;;  %v981_v10 = vpop.f32.mrf.mxu1 }
 0x229   : > { %v1095_v12 = vpack.c.bf16 %v705_v8, %v705_v8  ;;  %v1100_v13 = vpack.c.bf16 %v981_v10, %v981_v10 }
 0x22a   : > { %v2193_v14 = vpop.f32.mrf.mxu0  ;;  %v2233_v15 = vpop.f32.mrf.mxu1 }
 0x22b   : > { %v1113_v16 = vsel %vm1108_vm2, %v1095_v12, 0  ;;  %v1398_v17 = vsel %vm1350_vm3, %v1100_v13, 0  ;;  %2272 = vmatmul.mubr.msk.bf16.vlgmr.msra.gmra.mxu1 %vm1108_vm2, %v1094_v11 }
 0x22c   : > { %v708_v18 = vpop.f32.mrf.mxu0  ;;  %v984_v19 = vpop.f32.mrf.mxu1  ;;  %2252 = vmatpush3.bf16.xpose.msra.mxu0 %v1113_v16  ;;  %2282 = vmatpush3.bf16.msra.mxu1 %v1398_v17 }
 0x22d   : > { %2263 = vmatprep.subr.bf16.mxu0 %v2510_v9  ;;  %2283 = vmatprep.mubr.msk.bf16.mxu1 %vm2511_vm1, %v2510_v9 }
 0x22e   : > { %v2194_v20 = vpop.f32.mrf.mxu0  ;;  %v2234_v21 = vpop.f32.mrf.mxu1  ;;  %2293 = vmatprep.subr.bf16.mxu1 %v2510_v9 }
 0x230   : > { %v809_v22 = vpop.f32.mrf.mxu0  ;;  %v2806_v23 = vpop.f32.mrf.mxu1 }
 0x231   : > { %v1097_v25 = vpack.c.bf16 %v809_v22, %v809_v22 }
 0x232   : > { %v2209_v26 = vpop.f32.mrf.mxu0  ;;  %v2249_v27 = vpop.f32.mrf.mxu1 }
 0x233   : > { %v1205_v28 = vsel %vm1108_vm2, %v1097_v25, 0  ;;  %2254 = vmatmul.mubr.msk.bf16.vlgmr.msra.gmra.mxu0 %vm1108_vm2, %v1091_v24 }
 0x234   : > { %v812_v29 = vpop.f32.mrf.mxu0  ;;  %v1088_v30 = vpop.f32.mrf.mxu1  ;;  %2264 = vmatpush3.bf16.xpose.msra.mxu0 %v1205_v28  ;;  %2265 = vmatprep.mubr.msk.bf16.mxu0 %vm2511_vm1, %v2510_v9 }
 0x235   : > { %2275 = vmatprep.subr.bf16.mxu0 %v2510_v9 }
 0x236   : > { %v2210_v31 = vpop.f32.mrf.mxu0  ;;  %v2250_v32 = vpop.f32.mrf.mxu1 }
 0x238   : > { %v929_v33 = vpop.f32.mrf.mxu0 }
 0x239   : > { %v1099_v35 = vpack.c.bf16 %v929_v33, %v929_v33 }
 0x23a   : > { %v2225_v36 = vpop.f32.mrf.mxu0 }
 0x23b   : > { %v1352_v37 = vsel %vm1350_vm3, %v1099_v35, 0  ;;  %2266 = vmatmul.mubr.msk.bf16.vlgmr.msra.gmra.mxu0 %vm1108_vm2, %v1093_v34 }
 0x23c   : > { %v932_v38 = vpop.f32.mrf.mxu0  ;;  %2276 = vmatpush3.bf16.msra.mxu0 %v1352_v37  ;;  %2277 = vmatprep.mubr.msk.bf16.mxu0 %vm2511_vm1, %v2510_v9 }
 0x23d   : > { %2287 = vmatprep.subr.bf16.mxu0 %v2510_v9 }
 0x23e   : > { %v2226_v39 = vpop.f32.mrf.mxu0 }
 0x23f   : > { %v1102_v39 = vpack.c.bf16 %v2806_v23, %v2806_v23  ;;  %v1536_v23 = vld [vmem:[%s2992_s6] sm:$0xf] }
 0x240   : > { %v2820_v40 = vpop.f32.mrf.mxu0 }
 0x241   : > { %v1101_v35 = vpack.c.bf16 %v2820_v40, %v2820_v40 }
 0x242   : > { %v2241_v41 = vpop.f32.mrf.mxu0 }
 0x243   : > { %v1444_v41 = vsel %vm1350_vm3, %v1101_v35, 0 }
 0x244   : > { %v1036_v42 = vpop.f32.mrf.mxu0 }
 0x246   : > { %v2242_v43 = vpop.f32.mrf.mxu0 }
 0x2e3   : > { %v1195_v44 = vpop.f32.mrf.mxu1 }
 0x2e4   : > { %v1296_v59 = vsel %vm1107_vm4, %v1195_v44, -1e+30 }
 0x2e5   : > { %v2261_v45 = vpop.f32.mrf.mxu1  ;;  %v1302_v62 = vsel %vm1108_vm2, %v1296_v59, -inf }
 0x2e6   : > { %v1490_v45 = vsel %vm1350_vm3, %v1102_v39, 0 }
 0x2e7   : > { %v1198_v46 = vpop.f32.mrf.mxu1 }
 0x2e9   : > { %v2262_v47 = vpop.f32.mrf.mxu1 }
 0x2eb   : > { %v1287_v49 = vpop.f32.mrf.mxu1 }
 0x2ec   : > { %v1298_v63 = vsel %vm1107_vm4, %v1287_v49, -1e+30  ;;  %v1544_v49 = vsel %vm1350_vm3, %v1536_v23, 0  ;;  %v2416_v23 = vld [vmem:[%s2995_s9 + $0x8] sm:$0xff]  }
 0x2ed   : > { %v2273_v50 = vpop.f32.mrf.mxu1  ;;  %v1308_v4 = vsel %vm1108_vm2, %v1298_v63, -inf }
 0x2ef   : > { %v1290_v53 = vpop.f32.mrf.mxu1 }
 0x2f0   : > { %v1538_v53 = vld [vmem:[%s2992_s6 + $0x8] sm:$0xf] }
 0x2f1   : > { %v2274_v54 = vpop.f32.mrf.mxu1 }
 0x2f3   : > { %v1149_v55 = vpop.f32.mrf.mxu0 }
 0x2f4   : > { %v1295_v56 = vsel %vm1107_vm4, %v1149_v55, -1e+30 }
 0x2f5   : > { %v2255_v57 = vpop.f32.mrf.mxu0  ;;  %v1299_v58 = vsel %vm1108_vm2, %v1295_v56, -inf }
 0x2f6   : > { %1300 = vmax.xlane.f32.xlu1 %v1299_v58  ;;  %v1539_v58 = vld [vmem:[%s2992_s6 + $0xc] sm:$0xf] }
 0x2f7   : > { %v1152_v60 = vpop.f32.mrf.mxu0 }
 0x2f9   : > { %v2256_v61 = vpop.f32.mrf.mxu0 }
 0x2fa   : > { %1303 = vmax.xlane.f32.xlu1 %v1302_v62  ;;  %v1682_v62 = vsel %vm1350_vm3, %v1539_v58, 0  ;;  %v2420_v58 = vld [vmem:[%s2996_s10 + $0x28] sm:$0xff]  }
 0x2fb   : > { %v1241_v1 = vpop.f32.mrf.mxu0 }
 0x2fc   : > { %v1297_v2 = vsel %vm1107_vm4, %v1241_v1, -1e+30 }
 0x2fd   : > { %v2267_v3 = vpop.f32.mrf.mxu0  ;;  %v1305_v5 = vsel %vm1108_vm2, %v1297_v2, -inf }
 0x2fe   : > { %1309 = vmax.xlane.f32.xlu1 %v1308_v4  ;;  %1306 = vmax.xlane.f32.xlu0 %v1305_v5 }
 0x2ff   : > { %v1244_v6 = vpop.f32.mrf.mxu0 }
 0x301   : > { %v2268_v7 = vpop.f32.mrf.mxu0 }
 0x37f   : > { %v1301_v8 = vpop.xlane.xlu1 %1300 }
 0x380   : > { %v1311_v10 = vsub.f32 %v1295_v56, %v1301_v8  ;;  %v1636_v56 = vsel %vm1350_vm3, %v1538_v53, 0 }
 0x382   : > { %v1315_v11 = vmul.f32 1.442695, %v1311_v10 }
 0x383   : > { %v1304_v12 = vpop.xlane.xlu1 %1303 }
 0x384   : > { %2428 = vpow2.f32 %v1315_v11  ;;  %v1312_v13 = vsub.f32 %v1296_v59, %v1304_v12 }
 0x386   : > { %v1317_v14 = vmul.f32 1.442695, %v1312_v13 }
 0x387   : > { %v1310_v15 = vpop.xlane.xlu1 %1309  ;;  %v1307_v16 = vpop.xlane.xlu0 %1306 }
 0x388   : > { %2430 = vpow2.f32 %v1317_v14  ;;  %v1314_v17 = vsub.f32 %v1298_v63, %v1310_v15  ;;  %v1313_v18 = vsub.f32 %v1297_v2, %v1307_v16 }
 0x38a   : > { %v1321_v19 = vmul.f32 1.442695, %v1314_v17  ;;  %v1319_v20 = vmul.f32 1.442695, %v1313_v18 }
 0x38c   : > { %2432 = vpow2.f32 %v1321_v19 }
 0x38d   : > { %2434 = vpow2.f32 %v1319_v20 }
 0x391   : > { %v2429_v21 = vpop.eup %2428 }
 0x392   : > { %v1323_v22 = vsel %vm1108_vm2, %v2429_v21, 0.0 }
 0x393   : > { %1324 = vadd.xlane.f32.xlu0 %v1323_v22 }
 0x395   : > { %v2431_v24 = vpop.eup %2430 }
 0x396   : > { %v1326_v25 = vsel %vm1108_vm2, %v2431_v24, 0.0 }
 0x397   : > { %1327 = vadd.xlane.f32.xlu1 %v1326_v25 }
 0x399   : > { %v2433_v26 = vpop.eup %2432 }
 0x39a   : > { %v2435_v27 = vpop.eup %2434  ;;  %v1332_v28 = vsel %vm1108_vm2, %v2433_v26, 0.0 }
 0x39b   : > { %1333 = vadd.xlane.f32.xlu1 %v1332_v28  ;;  %v1329_v29 = vsel %vm1108_vm2, %v2435_v27, 0.0 }
 0x39c   : > { %1330 = vadd.xlane.f32.xlu0 %v1329_v29 }
 0x41c   : > { %v1325_v30 = vpop.xlane.xlu0 %1324 }
 0x41d   : > { %2436 = vrcp.f32 %v1325_v30 }
 0x420   : > { %v1328_v31 = vpop.xlane.xlu1 %1327 }
 0x421   : > { %2438 = vrcp.f32 %v1328_v31 }
 0x424   : > { %v1334_v32 = vpop.xlane.xlu1 %1333 }
 0x425   : > { %2440 = vrcp.f32 %v1334_v32  ;;  %v1331_v33 = vpop.xlane.xlu0 %1330 }
 0x426   : > { %2442 = vrcp.f32 %v1331_v33 }
 0x42a   : > { %v2437_v34 = vpop.eup %2436 }
 0x42b   : > { %v1339_v36 = vmul.f32 %v2437_v34, %v2429_v21 }
 0x42d   : > { %v1343_v37 = vpack.c.bf16 %v1339_v36, %v1339_v36 }
 0x42e   : > { %v2439_v38 = vpop.eup %2438 }
 0x42f   : > { %2278 = vmatmul.mubr.msk.bf16.vlgmr.msra.gmra.mxu0 %vm1108_vm2, %v1343_v37  ;;  %v1340_v42 = vmul.f32 %v2439_v38, %v2431_v24 }
 0x430   : > { %2288 = vmatpush3.bf16.msra.mxu0 %v1444_v41  ;;  %2289 = vmatprep.mubr.msk.bf16.mxu0 %vm2511_vm1, %v2510_v9 }
 0x431   : > { %v1344_v43 = vpack.c.bf16 %v1340_v42, %v1340_v42  ;;  %2299 = vmatprep.subr.bf16.mxu0 %v2510_v9 }
 0x432   : > { %v2441_v44 = vpop.eup %2440 }
 0x433   : > { %v2443_v40 = vpop.eup %2442  ;;  %2284 = vmatmul.mubr.msk.bf16.vlgmr.msra.gmra.mxu1 %vm1108_vm2, %v1344_v43  ;;  %v1342_v47 = vmul.f32 %v2441_v44, %v2433_v26 }
 0x434   : > { %2294 = vmatpush3.bf16.msra.mxu1 %v1490_v45  ;;  %v1341_v46 = vmul.f32 %v2443_v40, %v2435_v27  ;;  %2295 = vmatprep.mubr.msk.bf16.mxu1 %vm2511_vm1, %v2510_v9 }
 0x435   : > { %2305 = vmatprep.subr.bf16.mxu1 %v2510_v9  ;;  %v1346_v50 = vpack.c.bf16 %v1342_v47, %v1342_v47 }
 0x436   : > { %v1345_v48 = vpack.c.bf16 %v1341_v46, %v1341_v46 }
 0x438   : > { %2290 = vmatmul.mubr.msk.bf16.vlgmr.msra.gmra.mxu0 %vm1108_vm2, %v1345_v48 }
 0x439   : > { %2300 = vmatpush3.bf16.msra.mxu0 %v1544_v49  ;;  %2301 = vmatprep.mubr.msk.bf16.mxu0 %vm2511_vm1, %v2510_v9 }
 0x43a   : > { %2311 = vmatprep.subr.bf16.mxu0 %v2510_v9 }
 0x43b   : > { %2296 = vmatmul.mubr.msk.bf16.vlgmr.msra.gmra.mxu1 %vm1108_vm2, %v1346_v50  ;;  %v2066_v50 = vld [vmem:[%s2993_s7] ss:$0 sm:$0xff] }
 0x43c   : > { %2307 = vmatprep.mubr.msk.bf16.mxu1 %vm2511_vm1, %v2510_v9  ;;  %2306 = vmatpush3.bf16.msra.mxu1 %v1590_v52  ;;  %v2067_v52 = vld [vmem:[%s2994_s8] ss:$0 sm:$0xff] }
 0x43d   : > { %2317 = vmatprep.subr.bf16.mxu1 %v2510_v9 }
 0x4ef   : > { %v1388_v54 = vpop.f32.mrf.mxu0 }
 0x4f0   : > { %v1532_v55 = vpack.c.bf16 %v1388_v54, %v1388_v54 }
 0x4f1   : > { %v2279_v57 = vpop.f32.mrf.mxu0 }
 0x4f2   : > { %2302 = vmatmul.mubr.msk.bf16.vlgmr.msra.gmra.mxu0 %vm1108_vm2, %v1532_v55  ;;  %v2419_v57 = vld [vmem:[%s2996_s10 + $0x30] sm:$0xff]  }
 0x4f3   : > { %v1391_v59 = vpop.f32.mrf.mxu0  ;;  %v1434_v60 = vpop.f32.mrf.mxu1  ;;  %2312 = vmatpush3.bf16.msra.mxu0 %v1636_v56  ;;  %2313 = vmatprep.mubr.msk.bf16.mxu0 %vm2511_vm1, %v2510_v9  ;;  %v2418_v56 = vld [vmem:[%s2996_s10 + $0x38] sm:$0xff]  }
 0x4f4   : > { %v1533_v61 = vpack.c.bf16 %v1434_v60, %v1434_v60  ;;  %2323 = vmatprep.subr.bf16.mxu0 %v2510_v9  ;;  %v2421_v59 = vld [vmem:[%s2996_s10 + $0x20] sm:$0xff]   ;;  %v2422_v60 = vld [vmem:[%s2996_s10 + $0x18] sm:$0xff]  }
 0x4f5   : > { %v2280_v63 = vpop.f32.mrf.mxu0  ;;  %v2285_v1 = vpop.f32.mrf.mxu1 }
 0x4f6   : > { %2308 = vmatmul.mubr.msk.bf16.vlgmr.msra.gmra.mxu1 %vm1108_vm2, %v1533_v61  ;;  %v2423_v61 = vld [vmem:[%s2996_s10 + $0x10] sm:$0xff]   ;;  %v2425_v63 = vld [vmem:[%s2996_s10] sm:$0xff]  }
 0x4f7   : > { %v1437_v2 = vpop.f32.mrf.mxu1  ;;  %2318 = vmatpush3.bf16.msra.mxu1 %v1682_v62  ;;  %2319 = vmatprep.mubr.msk.bf16.mxu1 %vm2511_vm1, %v2510_v9  ;;  %v2424_v62 = vld [vmem:[%s2996_s10 + $0x8] sm:$0xff]  }
 0x4f8   : > { %v1480_v3 = vpop.f32.mrf.mxu0  ;;  %2331 = vmatprep.subr.bf16.mxu1 %v2510_v9 }
 0x4f9   : > { %v1534_v4 = vpack.c.bf16 %v1480_v3, %v1480_v3  ;;  %v2286_v5 = vpop.f32.mrf.mxu1 }
 0x4fa   : > { %v2291_v6 = vpop.f32.mrf.mxu0 }
 0x4fb   : > { %2314 = vmatmul.mubr.msk.bf16.vlgmr.msra.gmra.mxu0 %vm1108_vm2, %v1534_v4  ;;  %v1526_v7 = vpop.f32.mrf.mxu1 }
 0x4fc   : > { %v1483_v8 = vpop.f32.mrf.mxu0  ;;  %v1535_v10 = vpack.c.bf16 %v1526_v7, %v1526_v7  ;;  %2327 = vmatprep.mubr.msk.bf16.mxu0 %vm2511_vm1, %v2510_v9  ;;  %2324 = vmatpush3.bf16.msra.mxu0 %v2416_v23 }
 0x4fd   : > { %v2297_v11 = vpop.f32.mrf.mxu1  ;;  %2325 = vmatprep.subr.bf16.mxu0 %v2510_v9 }
 0x4fe   : > { %v2292_v12 = vpop.f32.mrf.mxu0  ;;  %2320 = vmatmul.mubr.msk.bf16.vlgmr.msra.gmra.mxu1 %vm1108_vm2, %v1535_v10 }
 0x4ff   : > { %v1529_v13 = vpop.f32.mrf.mxu1  ;;  %2347 = vmatprep.mubr.msk.bf16.mxu1 %vm2511_vm1, %v2510_v9  ;;  %2332 = vmatpush3.bf16.msra.mxu1 %v2418_v56 }
 0x500   : > { %2333 = vmatprep.subr.bf16.mxu1 %v2510_v9 }
 0x501   : > { %v2298_v14 = vpop.f32.mrf.mxu1 }
 0x503   : > { %2334 = vmatpush3.bf16.msra.mxu1 %v2419_v57 }
 0x504   : > { %2335 = vmatprep.subr.bf16.mxu1 %v2510_v9 }
 0x507   : > { %2336 = vmatpush3.bf16.msra.mxu1 %v2420_v58 }
 0x508   : > { %2337 = vmatprep.subr.bf16.mxu1 %v2510_v9 }
 0x50b   : > { %2338 = vmatpush3.bf16.msra.mxu1 %v2421_v59 }
 0x50c   : > { %2339 = vmatprep.subr.bf16.mxu1 %v2510_v9 }
 0x50f   : > { %2340 = vmatpush3.bf16.msra.mxu1 %v2422_v60 }
 0x510   : > { %2341 = vmatprep.subr.bf16.mxu1 %v2510_v9 }
 0x513   : > { %2342 = vmatpush3.bf16.msra.mxu1 %v2423_v61 }
 0x514   : > { %2343 = vmatprep.subr.bf16.mxu1 %v2510_v9 }
 0x517   : > { %2344 = vmatpush3.bf16.msra.mxu1 %v2424_v62 }
 0x518   : > { %2345 = vmatprep.subr.bf16.mxu1 %v2510_v9 }
 0x51b   : > { %2346 = vmatpush3.bf16.msra.mxu1 %v2425_v63 }
 0x5b2   : > { %v1580_v15 = vpop.f32.mrf.mxu0 }
 0x5b3   : > { %v1724_v24 = vsel %vm386_vm0, %v1580_v15, 0.0 }
 0x5b4   : > { %v2303_v16 = vpop.f32.mrf.mxu0 }
 0x5b6   : > { %v1583_v17 = vpop.f32.mrf.mxu0  ;;  %v1626_v18 = vpop.f32.mrf.mxu1 }
 0x5b7   : > { %v1725_v21 = vsel %vm386_vm0, %v1626_v18, 0.0 }
 0x5b8   : > { %v2304_v19 = vpop.f32.mrf.mxu0  ;;  %v2309_v20 = vpop.f32.mrf.mxu1  ;;  %v1726_v26 = vadd.f32 %v1725_v21, %v1724_v24 }
 0x5ba   : > { %v1629_v22 = vpop.f32.mrf.mxu1 }
 0x5bb   : > { %v1672_v25 = vpop.f32.mrf.mxu0 }
 0x5bc   : > { %v1727_v27 = vsel %vm386_vm0, %v1672_v25, 0.0  ;;  %v2310_v28 = vpop.f32.mrf.mxu1 }
 0x5bd   : > { %v2315_v29 = vpop.f32.mrf.mxu0  ;;  %v1728_v30 = vadd.f32 %v1727_v27, %v1726_v26 }
 0x5be   : > { %v1718_v31 = vpop.f32.mrf.mxu1 }
 0x5bf   : > { %v1675_v32 = vpop.f32.mrf.mxu0  ;;  %v1729_v33 = vsel %vm386_vm0, %v1718_v31, 0.0 }
 0x5c0   : > { %v1730_v34 = vadd.f32 %v1729_v33, %v1728_v30  ;;  %v2321_v35 = vpop.f32.mrf.mxu1 }
 0x5c1   : > { %v2316_v36 = vpop.f32.mrf.mxu0 }
 0x5c2   : > { %v2887_v37 = vadd.f32 %v1730_v34, %v2626_v0  ;;  %v1721_v38 = vpop.f32.mrf.mxu1  ;;  %v2417_v0 = vld [vmem:[%s2995_s9] sm:$0xff]  }
 0x5c3   : > { %2326 = vmatpush3.bf16.msra.mxu0 %v2417_v0 }
 0x5c4   : > { %v2322_v39 = vpop.f32.mrf.mxu1  ;;  %v1734_v41 = vsel %vm386_vm0, %v2887_v37, 0.0 }
 0x5c5   : > { %1735 = vadd.xlane.f32.xlu0 %v1734_v41 }
 0x64e   : > { %v1736_v42 = vpop.xlane.xlu0 %1735 }
 0x64f   : > { %v1737_v43 = vmul.f32 0.03125, %v1736_v42 }
 0x651   : > { %v1738_v44 = vsub.f32 %v2887_v37, %v1737_v43 }
 0x653   : > { %v1739_v40 = vmul.f32 %v1738_v44, %v1738_v44 }
 0x655   : > { %v1740_v45 = vsel %vm386_vm0, %v1739_v40, 0.0 }
 0x656   : > { %1741 = vadd.xlane.f32.xlu1 %v1740_v45 }
 0x6df   : > { %v1742_v46 = vpop.xlane.xlu1 %1741 }
 0x6e0   : > { %v1743_v47 = vmul.f32 0.03125, %v1742_v46 }
 0x6e2   : > { %v1744_v48 = vadd.f32 1e-05, %v1743_v47 }
 0x6e4   : > { %2444 = vrsqrt.f32 %v1744_v48 }
 0x6f1   : > { %v2445_v49 = vpop.eup %2444 }
 0x6f2   : > { %v1746_v51 = vmul.f32 %v2445_v49, %v1738_v44 }
 0x6f4   : > { %v1753_v53 = vmul.f32 %v2066_v50, %v1746_v51 }
 0x6f6   : > { %v1760_v54 = vadd.f32 %v2067_v52, %v1753_v53 }
 0x6f8   : > { %v1761_v55 = vpack.c.bf16 %v1760_v54, %v1760_v54 }
 0x6fa   : > { %2328 = vmatmul.mubr.msk.bf16.vlgmr.msra.gmra.mxu0 %vm386_vm0, %v1761_v55 }
 0x7ba   : > { %v1815_v1 = vpop.f32.mrf.mxu0 }
 0x7bb   : > { %v1822_v2 = vmul.f32 0.044715, %v1815_v1  ;;  %v1821_v12 = vmul.f32 0.5, %v1815_v1 }
 0x7bc   : > { %v2329_v3 = vpop.f32.mrf.mxu0 }
 0x7bd   : > { %v1823_v4 = vmul.f32 %v1822_v2, %v1815_v1 }
 0x7be   : > { %v1818_v5 = vpop.f32.mrf.mxu0 }
 0x7bf   : > { %v1824_v6 = vmul.f32 %v1823_v4, %v1815_v1 }
 0x7c0   : > { %v2330_v7 = vpop.f32.mrf.mxu0 }
 0x7c1   : > { %v1825_v8 = vadd.f32 %v1824_v6, %v1815_v1 }
 0x7c3   : > { %v1826_v10 = vmul.f32 0.7978846, %v1825_v8 }
 0x7c5   : > { %2446 = vtanh.f32 %v1826_v10 }
 0x7d2   : > { %v2447_v11 = vpop.eup %2446 }
 0x7d3   : > { %v1828_v13 = vadd.f32 1.0, %v2447_v11 }
 0x7d5   : > { %v1829_v14 = vmul.f32 %v1828_v13, %v1821_v12 }
 0x7d7   : > { %v1830_v15 = vpack.c.bf16 %v1829_v14, %v1829_v14 }
 0x7d9   : > { %2348 = vmatmul.mubr.bf16.vlgmr.msra.gmra.mxu1 %v1830_v15 }
 0x899   : > { %v1929_v9 = vpop.f32.mrf.mxu1 }
 0x89a   : > { %v1935_v16 = vadd.f32 %v1929_v9, %v2887_v37 }
 0x89b   : > { %v2349_v17 = vpop.f32.mrf.mxu1 }
 0x89c   : > { %1936 = vst.msk [vmem:[%s377_s12] sm:$0xff] %vm386_vm0, %v1935_v16 }
 0x89d   : > { %v1932_v18 = vpop.f32.mrf.mxu1 }
 0x89e   : > { %2461 = shalt.err (!%p2458_p3)
}
 0x89f   : > { %s2462_s12 = scalar_lea.hbm %s2944_s16, 128  ;;  %s2466_s15 = scalar_lea.hbm %s2997_s11, 256 }
 0x8a0   : > { %p2463_p4 = scmp.ne.s32.totalorder %s2944_s16, %s2462_s12  ;;  %p2467_p9 = scmp.lt.s32.totalorder %s2944_s16, %s2997_s11 }
 0x8a1   : > { %p2468_p10 = scmp.lt.s32.totalorder %s2466_s15, %s2462_s12 }
 0x8a2   : > { %p2464_p7 = pnand %p2463_p4, %p2611_p5 }
 0x8a3   : > { %p2469_p11 = por %p2468_p10, %p2467_p9 }
 0x8a4   : > { %p2465_p8 = pneg %p2464_p7 }
 0x8a6   : > { %p2470_p12 = pnand %p2469_p11, %p2465_p8 }
 0x8a8   : > { %2473 = shalt.err (!%p2470_p12)
}
 0x8a9   : > { %2351 = dma.vmem_to_hbm [thread:$0]  (%p2611_p5), %s2946_s13, 128, %s2944_s16, %s1938_s21   ;;  %v2350_v19 = vpop.f32.mrf.mxu1 }
 0x8aa PF: > { %p2357_p13 = scmp.ge.s32.totalorder %s2508_s20, 2  ;;  %s1963_s22 = sand.u32 1, %s2496_s17  }
 0x8ab   : > { %s1964_s0 = scalar_lea.sflag [#allocation3], %s1963_s22 }
 0x8ac   : > { %p2354_p0 = pnand %p2357_p13, %p2615_p6 }
 0x8ae   : > { %p2355_p1 = pneg %p2354_p0 }
 0x8b0   : > { %2491 = dma.done.wait (%p2355_p1), %s1964_s0, 128  }
 0x8b1   : > { %2493 = vsyncadd (%p2355_p1), %s1964_s0, 4294967168  ;;  %p21_p2 = scmp.ge.s32.totalorder %s2598_s23, 4   ;;  %s3002_s17 = smov %s2500_s18 }
 0x8b2   : > { %s3003_s18 = smov %s2504_s19  ;;  %s3004_s19 = smov %s2609_s26 }
 0x8b3   : > { %s3005_s20 = smov %s2598_s23  ;;  %23 = sbr.rel (!%p21_p2) target bundleno = 5 (0x5), region = 99 }
 0x8b8   :  { %1969 = vsyncpa [#allocation3], 1 }
 0x8b9   :  { %1971 = vsyncpa [#allocation3 + $0x1], 1 }

</bundles_post_ra>
